<compile_context>
chip_gen: v7x
topology: tpu7x:2x2x1
jax: 0.10.0
libtpu: 0.0.40
codegen_flags: <defaults>
</compile_context>

<pallas_src>
import functools

import jax
import jax.numpy as jnp
from jax.experimental import pallas as pl
from jax.experimental.pallas import tpu as pltpu


def _tropical_linear_kernel(x_ref, wt_ref, b_ref, o_ref):
    # x_ref : (TB, K)   rows on sublanes, in_channels on lanes
    # wt_ref: (K,  TO)  in_channels on sublanes, out_channels on lanes (lane-dense)
    # b_ref : (1,  TO)  bias tile
    # o_ref : (TB, TO)  output tile (lane-dense)
    #
    # Bias folded into the accumulator init: out = max(bias, max_k(x_k + w_k)).
    acc = jnp.broadcast_to(b_ref[...].astype(jnp.float32), o_ref.shape)  # (TB, TO)

    k_total = x_ref.shape[1]
    kc = 8                       # load K in sublane-sized chunks, unroll inside
    k0 = 0
    while k0 < k_total:          # static (trace-time) chunking -> full unroll
        cur = min(kc, k_total - k0)
        xc = x_ref[:, k0:k0 + cur].astype(jnp.float32)    # (TB, cur)
        wc = wt_ref[k0:k0 + cur, :].astype(jnp.float32)   # (cur, TO)
        for j in range(cur):     # static unroll: pure VPU add + max, no XLU reduce
            # (TB,1) broadcast over lanes  +  (1,TO) broadcast over sublanes
            acc = jnp.maximum(acc, xc[:, j:j + 1] + wc[j:j + 1, :])
        k0 += cur

    o_ref[...] = acc.astype(o_ref.dtype)


def _round_up(a, b):
    return -(-a // b) * b


@functools.partial(jax.jit, static_argnames=("block_rows",))
def algebraic_linear(x, weight, bias=None, *, block_rows=512):
    """Tropical (max-plus) AlgebraicLinear forward.

    x:      (..., in_channels)
    weight: (out_channels, in_channels)
    bias:   (out_channels,) or None
    returns (..., out_channels)
    """
    out_ch, in_ch = weight.shape
    lead = x.shape[:-1]
    xf = x.reshape(-1, in_ch)                       # (N, K)
    n_rows = xf.shape[0]

    # ---- row tiling: big tiles to amortize per-step overhead, clamp for small N
    tb = min(block_rows, _round_up(max(n_rows, 1), 8))
    tb = max(8, _round_up(tb, 8))
    n_total = _round_up(n_rows, tb)
    if n_total != n_rows:
        # padded rows are sliced off afterwards, so zero padding is safe
        xf = jnp.concatenate(
            [xf, jnp.zeros((n_total - n_rows, in_ch), xf.dtype)], axis=0)

    # ---- out-channel tiling: lane-dense (multiple of 128), O on the lane axis
    o_pad = _round_up(out_ch, 128)
    to = 128
    for cand in (1024, 512, 256, 128):
        if o_pad % cand == 0:
            to = cand
            break

    wt = weight.T                                    # (K, O): O -> lanes
    if o_pad != out_ch:
        # padded output columns are sliced off afterwards, pad value irrelevant
        wt = jnp.pad(wt, ((0, 0), (0, o_pad - out_ch)))
    if bias is None:
        # ⊕-identity for max so the bias term is a no-op
        bias_p = jnp.full((o_pad,), -jnp.inf, dtype=xf.dtype)
    else:
        bias_p = bias.astype(xf.dtype)
        if o_pad != out_ch:
            bias_p = jnp.pad(bias_p, (0, o_pad - out_ch))
    bias2d = bias_p.reshape(1, o_pad)

    # ---- VMEM budget with headroom (double-buffered pipelined operands)
    itemsize = jnp.dtype(xf.dtype).itemsize
    est = 2 * itemsize * (tb * in_ch + in_ch * to + tb * to + to) + (4 << 20)
    vmem_limit = int(min(max(est, 32 << 20), 96 << 20))

    out = pl.pallas_call(
        _tropical_linear_kernel,
        out_shape=jax.ShapeDtypeStruct((n_total, o_pad), x.dtype),
        grid_spec=pltpu.PrefetchScalarGridSpec(
            num_scalar_prefetch=0,
            grid=(n_total // tb, o_pad // to),
            in_specs=[
                pl.BlockSpec((tb, in_ch), lambda i, j: (i, 0)),   # x rows
                pl.BlockSpec((in_ch, to), lambda i, j: (0, j)),   # weight.T tile
                pl.BlockSpec((1, to), lambda i, j: (0, j)),       # bias tile
            ],
            out_specs=pl.BlockSpec((tb, to), lambda i, j: (i, j)),
        ),
        compiler_params=pltpu.CompilerParams(
            dimension_semantics=("parallel", "parallel"),
            vmem_limit_bytes=vmem_limit,
        ),
    )(xf, wt, bias2d)

    out = out[:n_rows, :out_ch]
    return out.reshape(*lead, out_ch)


def algebraic_linear_ref(x, weight, bias=None):
    # pure-JAX reference: max-plus matmul + max-bias
    r = jnp.max(x[..., None, :] + weight, axis=-1)   # (..., out)
    if bias is not None:
        r = jnp.maximum(r, bias)
    return r


if __name__ == "__main__":
    key = jax.random.PRNGKey(0)
    k_x, k_w, k_b = jax.random.split(key, 3)

    # small shapes consistent with the module: x = (batch, seq, in_channels)
    batch, seq = 2, 4
    in_channels = 32
    out_channels = 16

    # deterministic "randn"-style parameters (synthetic init, no checkpoint)
    x = jax.random.normal(k_x, (batch, seq, in_channels), dtype=jnp.float32)
    weight = jax.random.normal(k_w, (out_channels, in_channels), dtype=jnp.float32)
    bias = jax.random.normal(k_b, (out_channels,), dtype=jnp.float32)

    out = algebraic_linear(x, weight, bias)
    out = jax.block_until_ready(out)

    ref = algebraic_linear_ref(x, weight, bias)
    assert out.shape == (batch, seq, out_channels)
    assert jnp.allclose(out, ref, atol=1e-5, rtol=1e-5)

    print("KERNEL_OK")
</pallas_src>

<mosaic_0001>
module attributes {stable_mosaic.version = 11 : i64} {
  func.func @_tropical_linear_kernel(%arg0: i32, %arg1: i32, %arg2: memref<8x32xf32, #tpu.memory_space<vmem>>, %arg3: memref<32x128xf32, #tpu.memory_space<vmem>>, %arg4: memref<1x128xf32, #tpu.memory_space<vmem>>, %arg5: memref<8x128xf32, #tpu.memory_space<vmem>>) attributes {dimension_semantics = [#tpu.dimension_semantics<parallel>, #tpu.dimension_semantics<parallel>], iteration_bounds = array<i64: 1, 1>, scalar_prefetch = 0 : i64, scratch_operands = 0 : i64, tpu.core_type = #tpu.core_type<tc>, window_params = [{transform_indices = @transform_0, window_bounds = array<i64: 8, 32>}, {transform_indices = @transform_1, window_bounds = array<i64: 32, 128>}, {transform_indices = @transform_2, window_bounds = array<i64: 1, 128>}, {transform_indices = @transform_3, window_bounds = array<i64: 8, 128>}]} {
    %c0 = arith.constant 0 : index
    %c0_0 = arith.constant 0 : index
    %0 = vector.load %arg4[%c0, %c0_0] : memref<1x128xf32, #tpu.memory_space<vmem>>, vector<1x128xf32>
    %1 = vector.shape_cast %0 : vector<1x128xf32> to vector<1x128xf32>
    %2 = vector.broadcast %1 : vector<1x128xf32> to vector<8x128xf32>
    %c0_1 = arith.constant 0 : index
    %c0_2 = arith.constant 0 : index
    %3 = vector.load %arg2[%c0_1, %c0_2] : memref<8x32xf32, #tpu.memory_space<vmem>>, vector<8x8xf32>
    %c0_3 = arith.constant 0 : index
    %c0_4 = arith.constant 0 : index
    %4 = vector.load %arg3[%c0_3, %c0_4] : memref<32x128xf32, #tpu.memory_space<vmem>>, vector<8x128xf32>
    %5 = vector.extract_strided_slice %3 {offsets = [0, 0], sizes = [8, 1], strides = [1, 1]} : vector<8x8xf32> to vector<8x1xf32>
    %6 = vector.extract_strided_slice %4 {offsets = [0, 0], sizes = [1, 128], strides = [1, 1]} : vector<8x128xf32> to vector<1x128xf32>
    %7 = vector.broadcast %5 : vector<8x1xf32> to vector<8x128xf32>
    %8 = vector.broadcast %6 : vector<1x128xf32> to vector<8x128xf32>
    %9 = arith.addf %7, %8 : vector<8x128xf32>
    %10 = arith.maximumf %2, %9 : vector<8x128xf32>
    %11 = vector.extract_strided_slice %3 {offsets = [0, 1], sizes = [8, 1], strides = [1, 1]} : vector<8x8xf32> to vector<8x1xf32>
    %12 = vector.extract_strided_slice %4 {offsets = [1, 0], sizes = [1, 128], strides = [1, 1]} : vector<8x128xf32> to vector<1x128xf32>
    %13 = vector.broadcast %11 : vector<8x1xf32> to vector<8x128xf32>
    %14 = vector.broadcast %12 : vector<1x128xf32> to vector<8x128xf32>
    %15 = arith.addf %13, %14 : vector<8x128xf32>
    %16 = arith.maximumf %10, %15 : vector<8x128xf32>
    %17 = vector.extract_strided_slice %3 {offsets = [0, 2], sizes = [8, 1], strides = [1, 1]} : vector<8x8xf32> to vector<8x1xf32>
    %18 = vector.extract_strided_slice %4 {offsets = [2, 0], sizes = [1, 128], strides = [1, 1]} : vector<8x128xf32> to vector<1x128xf32>
    %19 = vector.broadcast %17 : vector<8x1xf32> to vector<8x128xf32>
    %20 = vector.broadcast %18 : vector<1x128xf32> to vector<8x128xf32>
    %21 = arith.addf %19, %20 : vector<8x128xf32>
    %22 = arith.maximumf %16, %21 : vector<8x128xf32>
    %23 = vector.extract_strided_slice %3 {offsets = [0, 3], sizes = [8, 1], strides = [1, 1]} : vector<8x8xf32> to vector<8x1xf32>
    %24 = vector.extract_strided_slice %4 {offsets = [3, 0], sizes = [1, 128], strides = [1, 1]} : vector<8x128xf32> to vector<1x128xf32>
    %25 = vector.broadcast %23 : vector<8x1xf32> to vector<8x128xf32>
    %26 = vector.broadcast %24 : vector<1x128xf32> to vector<8x128xf32>
    %27 = arith.addf %25, %26 : vector<8x128xf32>
    %28 = arith.maximumf %22, %27 : vector<8x128xf32>
    %29 = vector.extract_strided_slice %3 {offsets = [0, 4], sizes = [8, 1], strides = [1, 1]} : vector<8x8xf32> to vector<8x1xf32>
    %30 = vector.extract_strided_slice %4 {offsets = [4, 0], sizes = [1, 128], strides = [1, 1]} : vector<8x128xf32> to vector<1x128xf32>
    %31 = vector.broadcast %29 : vector<8x1xf32> to vector<8x128xf32>
    %32 = vector.broadcast %30 : vector<1x128xf32> to vector<8x128xf32>
    %33 = arith.addf %31, %32 : vector<8x128xf32>
    %34 = arith.maximumf %28, %33 : vector<8x128xf32>
    %35 = vector.extract_strided_slice %3 {offsets = [0, 5], sizes = [8, 1], strides = [1, 1]} : vector<8x8xf32> to vector<8x1xf32>
    %36 = vector.extract_strided_slice %4 {offsets = [5, 0], sizes = [1, 128], strides = [1, 1]} : vector<8x128xf32> to vector<1x128xf32>
    %37 = vector.broadcast %35 : vector<8x1xf32> to vector<8x128xf32>
    %38 = vector.broadcast %36 : vector<1x128xf32> to vector<8x128xf32>
    %39 = arith.addf %37, %38 : vector<8x128xf32>
    %40 = arith.maximumf %34, %39 : vector<8x128xf32>
    %41 = vector.extract_strided_slice %3 {offsets = [0, 6], sizes = [8, 1], strides = [1, 1]} : vector<8x8xf32> to vector<8x1xf32>
    %42 = vector.extract_strided_slice %4 {offsets = [6, 0], sizes = [1, 128], strides = [1, 1]} : vector<8x128xf32> to vector<1x128xf32>
    %43 = vector.broadcast %41 : vector<8x1xf32> to vector<8x128xf32>
    %44 = vector.broadcast %42 : vector<1x128xf32> to vector<8x128xf32>
    %45 = arith.addf %43, %44 : vector<8x128xf32>
    %46 = arith.maximumf %40, %45 : vector<8x128xf32>
    %47 = vector.extract_strided_slice %3 {offsets = [0, 7], sizes = [8, 1], strides = [1, 1]} : vector<8x8xf32> to vector<8x1xf32>
    %48 = vector.extract_strided_slice %4 {offsets = [7, 0], sizes = [1, 128], strides = [1, 1]} : vector<8x128xf32> to vector<1x128xf32>
    %49 = vector.broadcast %47 : vector<8x1xf32> to vector<8x128xf32>
    %50 = vector.broadcast %48 : vector<1x128xf32> to vector<8x128xf32>
    %51 = arith.addf %49, %50 : vector<8x128xf32>
    %52 = arith.maximumf %46, %51 : vector<8x128xf32>
    %c0_5 = arith.constant 0 : index
    %c8 = arith.constant 8 : index
    %53 = vector.load %arg2[%c0_5, %c8] : memref<8x32xf32, #tpu.memory_space<vmem>>, vector<8x8xf32>
    %c8_6 = arith.constant 8 : index
    %c0_7 = arith.constant 0 : index
    %54 = vector.load %arg3[%c8_6, %c0_7] : memref<32x128xf32, #tpu.memory_space<vmem>>, vector<8x128xf32>
    %55 = vector.extract_strided_slice %53 {offsets = [0, 0], sizes = [8, 1], strides = [1, 1]} : vector<8x8xf32> to vector<8x1xf32>
    %56 = vector.extract_strided_slice %54 {offsets = [0, 0], sizes = [1, 128], strides = [1, 1]} : vector<8x128xf32> to vector<1x128xf32>
    %57 = vector.broadcast %55 : vector<8x1xf32> to vector<8x128xf32>
    %58 = vector.broadcast %56 : vector<1x128xf32> to vector<8x128xf32>
    %59 = arith.addf %57, %58 : vector<8x128xf32>
    %60 = arith.maximumf %52, %59 : vector<8x128xf32>
    %61 = vector.extract_strided_slice %53 {offsets = [0, 1], sizes = [8, 1], strides = [1, 1]} : vector<8x8xf32> to vector<8x1xf32>
    %62 = vector.extract_strided_slice %54 {offsets = [1, 0], sizes = [1, 128], strides = [1, 1]} : vector<8x128xf32> to vector<1x128xf32>
    %63 = vector.broadcast %61 : vector<8x1xf32> to vector<8x128xf32>
    %64 = vector.broadcast %62 : vector<1x128xf32> to vector<8x128xf32>
    %65 = arith.addf %63, %64 : vector<8x128xf32>
    %66 = arith.maximumf %60, %65 : vector<8x128xf32>
    %67 = vector.extract_strided_slice %53 {offsets = [0, 2], sizes = [8, 1], strides = [1, 1]} : vector<8x8xf32> to vector<8x1xf32>
    %68 = vector.extract_strided_slice %54 {offsets = [2, 0], sizes = [1, 128], strides = [1, 1]} : vector<8x128xf32> to vector<1x128xf32>
    %69 = vector.broadcast %67 : vector<8x1xf32> to vector<8x128xf32>
    %70 = vector.broadcast %68 : vector<1x128xf32> to vector<8x128xf32>
    %71 = arith.addf %69, %70 : vector<8x128xf32>
    %72 = arith.maximumf %66, %71 : vector<8x128xf32>
    %73 = vector.extract_strided_slice %53 {offsets = [0, 3], sizes = [8, 1], strides = [1, 1]} : vector<8x8xf32> to vector<8x1xf32>
    %74 = vector.extract_strided_slice %54 {offsets = [3, 0], sizes = [1, 128], strides = [1, 1]} : vector<8x128xf32> to vector<1x128xf32>
    %75 = vector.broadcast %73 : vector<8x1xf32> to vector<8x128xf32>
    %76 = vector.broadcast %74 : vector<1x128xf32> to vector<8x128xf32>
    %77 = arith.addf %75, %76 : vector<8x128xf32>
    %78 = arith.maximumf %72, %77 : vector<8x128xf32>
    %79 = vector.extract_strided_slice %53 {offsets = [0, 4], sizes = [8, 1], strides = [1, 1]} : vector<8x8xf32> to vector<8x1xf32>
    %80 = vector.extract_strided_slice %54 {offsets = [4, 0], sizes = [1, 128], strides = [1, 1]} : vector<8x128xf32> to vector<1x128xf32>
    %81 = vector.broadcast %79 : vector<8x1xf32> to vector<8x128xf32>
    %82 = vector.broadcast %80 : vector<1x128xf32> to vector<8x128xf32>
    %83 = arith.addf %81, %82 : vector<8x128xf32>
    %84 = arith.maximumf %78, %83 : vector<8x128xf32>
    %85 = vector.extract_strided_slice %53 {offsets = [0, 5], sizes = [8, 1], strides = [1, 1]} : vector<8x8xf32> to vector<8x1xf32>
    %86 = vector.extract_strided_slice %54 {offsets = [5, 0], sizes = [1, 128], strides = [1, 1]} : vector<8x128xf32> to vector<1x128xf32>
    %87 = vector.broadcast %85 : vector<8x1xf32> to vector<8x128xf32>
    %88 = vector.broadcast %86 : vector<1x128xf32> to vector<8x128xf32>
    %89 = arith.addf %87, %88 : vector<8x128xf32>
    %90 = arith.maximumf %84, %89 : vector<8x128xf32>
    %91 = vector.extract_strided_slice %53 {offsets = [0, 6], sizes = [8, 1], strides = [1, 1]} : vector<8x8xf32> to vector<8x1xf32>
    %92 = vector.extract_strided_slice %54 {offsets = [6, 0], sizes = [1, 128], strides = [1, 1]} : vector<8x128xf32> to vector<1x128xf32>
    %93 = vector.broadcast %91 : vector<8x1xf32> to vector<8x128xf32>
    %94 = vector.broadcast %92 : vector<1x128xf32> to vector<8x128xf32>
    %95 = arith.addf %93, %94 : vector<8x128xf32>
    %96 = arith.maximumf %90, %95 : vector<8x128xf32>
    %97 = vector.extract_strided_slice %53 {offsets = [0, 7], sizes = [8, 1], strides = [1, 1]} : vector<8x8xf32> to vector<8x1xf32>
    %98 = vector.extract_strided_slice %54 {offsets = [7, 0], sizes = [1, 128], strides = [1, 1]} : vector<8x128xf32> to vector<1x128xf32>
    %99 = vector.broadcast %97 : vector<8x1xf32> to vector<8x128xf32>
    %100 = vector.broadcast %98 : vector<1x128xf32> to vector<8x128xf32>
    %101 = arith.addf %99, %100 : vector<8x128xf32>
    %102 = arith.maximumf %96, %101 : vector<8x128xf32>
    %c0_8 = arith.constant 0 : index
    %c16 = arith.constant 16 : index
    %103 = vector.load %arg2[%c0_8, %c16] : memref<8x32xf32, #tpu.memory_space<vmem>>, vector<8x8xf32>
    %c16_9 = arith.constant 16 : index
    %c0_10 = arith.constant 0 : index
    %104 = vector.load %arg3[%c16_9, %c0_10] : memref<32x128xf32, #tpu.memory_space<vmem>>, vector<8x128xf32>
    %105 = vector.extract_strided_slice %103 {offsets = [0, 0], sizes = [8, 1], strides = [1, 1]} : vector<8x8xf32> to vector<8x1xf32>
    %106 = vector.extract_strided_slice %104 {offsets = [0, 0], sizes = [1, 128], strides = [1, 1]} : vector<8x128xf32> to vector<1x128xf32>
    %107 = vector.broadcast %105 : vector<8x1xf32> to vector<8x128xf32>
    %108 = vector.broadcast %106 : vector<1x128xf32> to vector<8x128xf32>
    %109 = arith.addf %107, %108 : vector<8x128xf32>
    %110 = arith.maximumf %102, %109 : vector<8x128xf32>
    %111 = vector.extract_strided_slice %103 {offsets = [0, 1], sizes = [8, 1], strides = [1, 1]} : vector<8x8xf32> to vector<8x1xf32>
    %112 = vector.extract_strided_slice %104 {offsets = [1, 0], sizes = [1, 128], strides = [1, 1]} : vector<8x128xf32> to vector<1x128xf32>
    %113 = vector.broadcast %111 : vector<8x1xf32> to vector<8x128xf32>
    %114 = vector.broadcast %112 : vector<1x128xf32> to vector<8x128xf32>
    %115 = arith.addf %113, %114 : vector<8x128xf32>
    %116 = arith.maximumf %110, %115 : vector<8x128xf32>
    %117 = vector.extract_strided_slice %103 {offsets = [0, 2], sizes = [8, 1], strides = [1, 1]} : vector<8x8xf32> to vector<8x1xf32>
    %118 = vector.extract_strided_slice %104 {offsets = [2, 0], sizes = [1, 128], strides = [1, 1]} : vector<8x128xf32> to vector<1x128xf32>
    %119 = vector.broadcast %117 : vector<8x1xf32> to vector<8x128xf32>
    %120 = vector.broadcast %118 : vector<1x128xf32> to vector<8x128xf32>
    %121 = arith.addf %119, %120 : vector<8x128xf32>
    %122 = arith.maximumf %116, %121 : vector<8x128xf32>
    %123 = vector.extract_strided_slice %103 {offsets = [0, 3], sizes = [8, 1], strides = [1, 1]} : vector<8x8xf32> to vector<8x1xf32>
    %124 = vector.extract_strided_slice %104 {offsets = [3, 0], sizes = [1, 128], strides = [1, 1]} : vector<8x128xf32> to vector<1x128xf32>
    %125 = vector.broadcast %123 : vector<8x1xf32> to vector<8x128xf32>
    %126 = vector.broadcast %124 : vector<1x128xf32> to vector<8x128xf32>
    %127 = arith.addf %125, %126 : vector<8x128xf32>
    %128 = arith.maximumf %122, %127 : vector<8x128xf32>
    %129 = vector.extract_strided_slice %103 {offsets = [0, 4], sizes = [8, 1], strides = [1, 1]} : vector<8x8xf32> to vector<8x1xf32>
    %130 = vector.extract_strided_slice %104 {offsets = [4, 0], sizes = [1, 128], strides = [1, 1]} : vector<8x128xf32> to vector<1x128xf32>
    %131 = vector.broadcast %129 : vector<8x1xf32> to vector<8x128xf32>
    %132 = vector.broadcast %130 : vector<1x128xf32> to vector<8x128xf32>
    %133 = arith.addf %131, %132 : vector<8x128xf32>
    %134 = arith.maximumf %128, %133 : vector<8x128xf32>
    %135 = vector.extract_strided_slice %103 {offsets = [0, 5], sizes = [8, 1], strides = [1, 1]} : vector<8x8xf32> to vector<8x1xf32>
    %136 = vector.extract_strided_slice %104 {offsets = [5, 0], sizes = [1, 128], strides = [1, 1]} : vector<8x128xf32> to vector<1x128xf32>
    %137 = vector.broadcast %135 : vector<8x1xf32> to vector<8x128xf32>
    %138 = vector.broadcast %136 : vector<1x128xf32> to vector<8x128xf32>
    %139 = arith.addf %137, %138 : vector<8x128xf32>
    %140 = arith.maximumf %134, %139 : vector<8x128xf32>
    %141 = vector.extract_strided_slice %103 {offsets = [0, 6], sizes = [8, 1], strides = [1, 1]} : vector<8x8xf32> to vector<8x1xf32>
    %142 = vector.extract_strided_slice %104 {offsets = [6, 0], sizes = [1, 128], strides = [1, 1]} : vector<8x128xf32> to vector<1x128xf32>
    %143 = vector.broadcast %141 : vector<8x1xf32> to vector<8x128xf32>
    %144 = vector.broadcast %142 : vector<1x128xf32> to vector<8x128xf32>
    %145 = arith.addf %143, %144 : vector<8x128xf32>
    %146 = arith.maximumf %140, %145 : vector<8x128xf32>
    %147 = vector.extract_strided_slice %103 {offsets = [0, 7], sizes = [8, 1], strides = [1, 1]} : vector<8x8xf32> to vector<8x1xf32>
    %148 = vector.extract_strided_slice %104 {offsets = [7, 0], sizes = [1, 128], strides = [1, 1]} : vector<8x128xf32> to vector<1x128xf32>
    %149 = vector.broadcast %147 : vector<8x1xf32> to vector<8x128xf32>
    %150 = vector.broadcast %148 : vector<1x128xf32> to vector<8x128xf32>
    %151 = arith.addf %149, %150 : vector<8x128xf32>
    %152 = arith.maximumf %146, %151 : vector<8x128xf32>
    %c0_11 = arith.constant 0 : index
    %c24 = arith.constant 24 : index
    %153 = vector.load %arg2[%c0_11, %c24] : memref<8x32xf32, #tpu.memory_space<vmem>>, vector<8x8xf32>
    %c24_12 = arith.constant 24 : index
    %c0_13 = arith.constant 0 : index
    %154 = vector.load %arg3[%c24_12, %c0_13] : memref<32x128xf32, #tpu.memory_space<vmem>>, vector<8x128xf32>
    %155 = vector.extract_strided_slice %153 {offsets = [0, 0], sizes = [8, 1], strides = [1, 1]} : vector<8x8xf32> to vector<8x1xf32>
    %156 = vector.extract_strided_slice %154 {offsets = [0, 0], sizes = [1, 128], strides = [1, 1]} : vector<8x128xf32> to vector<1x128xf32>
    %157 = vector.broadcast %155 : vector<8x1xf32> to vector<8x128xf32>
    %158 = vector.broadcast %156 : vector<1x128xf32> to vector<8x128xf32>
    %159 = arith.addf %157, %158 : vector<8x128xf32>
    %160 = arith.maximumf %152, %159 : vector<8x128xf32>
    %161 = vector.extract_strided_slice %153 {offsets = [0, 1], sizes = [8, 1], strides = [1, 1]} : vector<8x8xf32> to vector<8x1xf32>
    %162 = vector.extract_strided_slice %154 {offsets = [1, 0], sizes = [1, 128], strides = [1, 1]} : vector<8x128xf32> to vector<1x128xf32>
    %163 = vector.broadcast %161 : vector<8x1xf32> to vector<8x128xf32>
    %164 = vector.broadcast %162 : vector<1x128xf32> to vector<8x128xf32>
    %165 = arith.addf %163, %164 : vector<8x128xf32>
    %166 = arith.maximumf %160, %165 : vector<8x128xf32>
    %167 = vector.extract_strided_slice %153 {offsets = [0, 2], sizes = [8, 1], strides = [1, 1]} : vector<8x8xf32> to vector<8x1xf32>
    %168 = vector.extract_strided_slice %154 {offsets = [2, 0], sizes = [1, 128], strides = [1, 1]} : vector<8x128xf32> to vector<1x128xf32>
    %169 = vector.broadcast %167 : vector<8x1xf32> to vector<8x128xf32>
    %170 = vector.broadcast %168 : vector<1x128xf32> to vector<8x128xf32>
    %171 = arith.addf %169, %170 : vector<8x128xf32>
    %172 = arith.maximumf %166, %171 : vector<8x128xf32>
    %173 = vector.extract_strided_slice %153 {offsets = [0, 3], sizes = [8, 1], strides = [1, 1]} : vector<8x8xf32> to vector<8x1xf32>
    %174 = vector.extract_strided_slice %154 {offsets = [3, 0], sizes = [1, 128], strides = [1, 1]} : vector<8x128xf32> to vector<1x128xf32>
    %175 = vector.broadcast %173 : vector<8x1xf32> to vector<8x128xf32>
    %176 = vector.broadcast %174 : vector<1x128xf32> to vector<8x128xf32>
    %177 = arith.addf %175, %176 : vector<8x128xf32>
    %178 = arith.maximumf %172, %177 : vector<8x128xf32>
    %179 = vector.extract_strided_slice %153 {offsets = [0, 4], sizes = [8, 1], strides = [1, 1]} : vector<8x8xf32> to vector<8x1xf32>
    %180 = vector.extract_strided_slice %154 {offsets = [4, 0], sizes = [1, 128], strides = [1, 1]} : vector<8x128xf32> to vector<1x128xf32>
    %181 = vector.broadcast %179 : vector<8x1xf32> to vector<8x128xf32>
    %182 = vector.broadcast %180 : vector<1x128xf32> to vector<8x128xf32>
    %183 = arith.addf %181, %182 : vector<8x128xf32>
    %184 = arith.maximumf %178, %183 : vector<8x128xf32>
    %185 = vector.extract_strided_slice %153 {offsets = [0, 5], sizes = [8, 1], strides = [1, 1]} : vector<8x8xf32> to vector<8x1xf32>
    %186 = vector.extract_strided_slice %154 {offsets = [5, 0], sizes = [1, 128], strides = [1, 1]} : vector<8x128xf32> to vector<1x128xf32>
    %187 = vector.broadcast %185 : vector<8x1xf32> to vector<8x128xf32>
    %188 = vector.broadcast %186 : vector<1x128xf32> to vector<8x128xf32>
    %189 = arith.addf %187, %188 : vector<8x128xf32>
    %190 = arith.maximumf %184, %189 : vector<8x128xf32>
    %191 = vector.extract_strided_slice %153 {offsets = [0, 6], sizes = [8, 1], strides = [1, 1]} : vector<8x8xf32> to vector<8x1xf32>
    %192 = vector.extract_strided_slice %154 {offsets = [6, 0], sizes = [1, 128], strides = [1, 1]} : vector<8x128xf32> to vector<1x128xf32>
    %193 = vector.broadcast %191 : vector<8x1xf32> to vector<8x128xf32>
    %194 = vector.broadcast %192 : vector<1x128xf32> to vector<8x128xf32>
    %195 = arith.addf %193, %194 : vector<8x128xf32>
    %196 = arith.maximumf %190, %195 : vector<8x128xf32>
    %197 = vector.extract_strided_slice %153 {offsets = [0, 7], sizes = [8, 1], strides = [1, 1]} : vector<8x8xf32> to vector<8x1xf32>
    %198 = vector.extract_strided_slice %154 {offsets = [7, 0], sizes = [1, 128], strides = [1, 1]} : vector<8x128xf32> to vector<1x128xf32>
    %199 = vector.broadcast %197 : vector<8x1xf32> to vector<8x128xf32>
    %200 = vector.broadcast %198 : vector<1x128xf32> to vector<8x128xf32>
    %201 = arith.addf %199, %200 : vector<8x128xf32>
    %202 = arith.maximumf %196, %201 : vector<8x128xf32>
    %c0_14 = arith.constant 0 : index
    %c0_15 = arith.constant 0 : index
    %203 = vector.load %arg5[%c0_14, %c0_15] : memref<8x128xf32, #tpu.memory_space<vmem>>, vector<8x128xf32>
    tpu.vector_store %arg5[%c0_14, %c0_15], %202 {strides = array<i32>} : memref<8x128xf32, #tpu.memory_space<vmem>>, vector<8x128xf32>,
    return
  }
  func.func @transform_0(%arg0: i32, %arg1: i32) -> (i32, i32) {
    %c0_i32 = arith.constant 0 : i32
    %c0_i32_0 = arith.constant 0 : i32
    return %arg0, %c0_i32 : i32, i32
  }
  func.func @transform_1(%arg0: i32, %arg1: i32) -> (i32, i32) {
    %c0_i32 = arith.constant 0 : i32
    %c0_i32_0 = arith.constant 0 : i32
    return %c0_i32, %arg1 : i32, i32
  }
  func.func @transform_2(%arg0: i32, %arg1: i32) -> (i32, i32) {
    %c0_i32 = arith.constant 0 : i32
    %c0_i32_0 = arith.constant 0 : i32
    return %c0_i32, %arg1 : i32, i32
  }
  func.func @transform_3(%arg0: i32, %arg1: i32) -> (i32, i32) {
    %c0_i32 = arith.constant 0 : i32
    return %arg0, %arg1 : i32, i32
  }
}

</mosaic_0001>

<bundles_post_ra>
// kernel: algebraic_linear.1
= control target key start
LH: loop header
LB: loop body
LE: loop exit
PB: predicated region body
PF: predicated region fallthrough
CT: control target
= control target key end

     0   :  { %v454_v1 = vmov 2   ;;  %v455_v2 = vmov 0   ;;  %s619_s0 = inlined_call_operand.vmem [shape: f32[8,32], index: 0, kind: input, shape index: {}]   ;;  %s620_s1 = inlined_call_operand.vmem [shape: f32[32,128], index: 1, kind: input, shape index: {}]   ;;  %s621_s2 = inlined_call_operand.vmem [shape: f32[1,128], index: 2, kind: input, shape index: {}]   ;;  %s622_s3 = inlined_call_operand.hbm [shape: f32[8,128], index: 3, kind: output, shape index: {}]  }
   0x1   :  { %v510_v0 = vld [vmem:[%s619_s0] sm:$0xff]  ;;  %399 = vset.pattern.permute.xlu1 %v454_v1  ;;  %397 = vset.pattern.permute.xlu0 %v455_v2 }
   0x2   :  { %8 = vsyncpa [#allocation3], 0  ;;  %46 = vperm.xlu1 %399, %v510_v0   ;;  %26 = vperm.xlu0 %397, %v510_v0   ;;  %v456_v3 = vmov 3   ;;  %v457_v4 = vmov 1   ;;  %v458_v5 = vmov 4   ;;  %v459_v6 = vmov 5  }
   0x3   :  { %v460_v7 = vmov 6   ;;  %v461_v8 = vmov 8   ;;  %v462_v9 = vmov 7   ;;  %v463_v10 = vmov 11   ;;  %v23_v36 = vld [vmem:[%s620_s1] sm:$0xff] }
   0x4   :  { %v464_v11 = vmov 9   ;;  %v465_v12 = vmov 14   ;;  %v466_v13 = vmov 10   ;;  %v467_v14 = vmov 17   ;;  %v363_v42 = vld [vmem:[%s621_s2] ss:$0 sm:$0xff] }
   0x5   :  { %v468_v15 = vmov 12   ;;  %v469_v16 = vmov 20   ;;  %v470_v17 = vmov 13   ;;  %v471_v18 = vmov 23  }
   0x6   :  { %400 = vset.pattern.permute.xlu1 %v456_v3  ;;  %398 = vset.pattern.permute.xlu0 %v457_v4  ;;  %v472_v19 = vmov 15   ;;  %v473_v20 = vmov 26   ;;  %v474_v21 = vmov 16   ;;  %v475_v22 = vmov 29  }
   0x7   :  { %56 = vperm.xlu1 %400, %v510_v0   ;;  %36 = vperm.xlu0 %398, %v510_v0   ;;  %v476_v23 = vmov 18   ;;  %v477_v24 = vmov 31   ;;  %v478_v25 = vmov 19   ;;  %v479_v26 = vmov 21  }
   0x8   :  { %v480_v27 = vmov 22   ;;  %v481_v28 = vmov 24   ;;  %v482_v29 = vmov 25   ;;  %v483_v30 = vmov 27  }
   0x9   :  { %v484_v31 = vmov 28   ;;  %v485_v32 = vmov 30   ;;  %v29_v33 = vlaneseq }
   0xb   :  { %401 = vset.pattern.permute.xlu1 %v458_v5  ;;  %402 = vset.pattern.permute.xlu0 %v459_v6  ;;  %v30_v34 = vshrl.u32 %v29_v33, 7  ;;  %v105_v6 = vld [vmem:[%s620_s1 + $0x8] sm:$0xff] }
   0xc   :  { %66 = vperm.xlu1 %401, %v510_v0   ;;  %76 = vperm.xlu0 %402, %v510_v0  }
   0xd   :  { %v544_v35 = vsub.s32 0, %v30_v34  ;;  %v550_v38 = vsub.s32 1, %v30_v34  ;;  %v552_v39 = vsub.s32 2, %v30_v34  ;;  %v557_v44 = vsub.s32 3, %v30_v34 }
   0xe   :  { %v560_v46 = vsub.s32 4, %v30_v34  ;;  %v563_v51 = vsub.s32 5, %v30_v34  ;;  %v568_v58 = vsub.s32 6, %v30_v34  ;;  %v571_v3 = vsub.s32 7, %v30_v34 }
   0xf   :  { %v32_v37 = vrot.slane %v23_v36, %v544_v35  ;;  %v42_v45 = vrot.slane %v23_v36, %v550_v38  ;;  %v52_v47 = vrot.slane %v23_v36, %v552_v39  ;;  %v62_v52 = vrot.slane %v23_v36, %v557_v44 }
  0x10   :  { %403 = vset.pattern.permute.xlu1 %v460_v7  ;;  %405 = vset.pattern.permute.xlu0 %v461_v8  ;;  %v72_v54 = vrot.slane %v23_v36, %v560_v46  ;;  %v82_v57 = vrot.slane %v23_v36, %v563_v51  ;;  %v92_v2 = vrot.slane %v23_v36, %v568_v58 }
  0x11   :  { %86 = vperm.xlu1 %403, %v510_v0   ;;  %107 = vperm.xlu0 %405, %v510_v0   ;;  %v163_v33 = vrot.slane %v105_v6, %v563_v51  ;;  %v173_v34 = vrot.slane %v105_v6, %v568_v58 }
  0x15   :  { %404 = vset.pattern.permute.xlu1 %v462_v9  ;;  %408 = vset.pattern.permute.xlu0 %v463_v10  ;;  %v102_v9 = vrot.slane %v23_v36, %v571_v3  ;;  %v113_v10 = vrot.slane %v105_v6, %v544_v35 }
  0x16   :  { %96 = vperm.xlu1 %404, %v510_v0   ;;  %137 = vperm.xlu0 %408, %v510_v0  }
  0x1a   :  { %406 = vset.pattern.permute.xlu1 %v464_v11  ;;  %411 = vset.pattern.permute.xlu0 %v465_v12 }
  0x1b   :  { %117 = vperm.xlu1 %406, %v510_v0   ;;  %167 = vperm.xlu0 %411, %v510_v0  }
  0x1f   :  { %407 = vset.pattern.permute.xlu1 %v466_v13  ;;  %414 = vset.pattern.permute.xlu0 %v467_v14 }
  0x20   :  { %127 = vperm.xlu1 %407, %v510_v0   ;;  %198 = vperm.xlu0 %414, %v510_v0  }
  0x24   :  { %409 = vset.pattern.permute.xlu1 %v468_v15  ;;  %417 = vset.pattern.permute.xlu0 %v469_v16 }
  0x25   :  { %147 = vperm.xlu1 %409, %v510_v0   ;;  %228 = vperm.xlu0 %417, %v510_v0  }
  0x29   :  { %410 = vset.pattern.permute.xlu1 %v470_v17  ;;  %420 = vset.pattern.permute.xlu0 %v471_v18  ;;  %v123_v17 = vrot.slane %v105_v6, %v550_v38 }
  0x2a   :  { %157 = vperm.xlu1 %410, %v510_v0   ;;  %258 = vperm.xlu0 %420, %v510_v0  }
  0x2e   :  { %412 = vset.pattern.permute.xlu1 %v472_v19  ;;  %423 = vset.pattern.permute.xlu0 %v473_v20 }
  0x2f   :  { %177 = vperm.xlu1 %412, %v510_v0   ;;  %289 = vperm.xlu0 %423, %v510_v0  }
  0x33   :  { %413 = vset.pattern.permute.xlu1 %v474_v21  ;;  %426 = vset.pattern.permute.xlu0 %v475_v22  ;;  %v133_v21 = vrot.slane %v105_v6, %v552_v39  ;;  %v143_v22 = vrot.slane %v105_v6, %v557_v44 }
  0x34   :  { %188 = vperm.xlu1 %413, %v510_v0   ;;  %319 = vperm.xlu0 %426, %v510_v0  }
  0x38   :  { %415 = vset.pattern.permute.xlu1 %v476_v23  ;;  %429 = vset.pattern.permute.xlu0 %v477_v24 }
  0x39   :  { %208 = vperm.xlu1 %415, %v510_v0  }
  0x3d   :  { %416 = vset.pattern.permute.xlu1 %v478_v25 }
  0x3e   :  { %218 = vperm.xlu1 %416, %v510_v0  }
  0x42   :  { %418 = vset.pattern.permute.xlu1 %v479_v26 }
  0x43   :  { %238 = vperm.xlu1 %418, %v510_v0  }
  0x47   :  { %419 = vset.pattern.permute.xlu1 %v480_v27 }
  0x48   :  { %248 = vperm.xlu1 %419, %v510_v0  }
  0x4c   :  { %421 = vset.pattern.permute.xlu1 %v481_v28 }
  0x4d   :  { %269 = vperm.xlu1 %421, %v510_v0  }
  0x51   :  { %422 = vset.pattern.permute.xlu1 %v482_v29  ;;  %v153_v29 = vrot.slane %v105_v6, %v560_v46 }
  0x52   :  { %279 = vperm.xlu1 %422, %v510_v0  }
  0x56   :  { %424 = vset.pattern.permute.xlu1 %v483_v30 }
  0x57   :  { %299 = vperm.xlu1 %424, %v510_v0  }
  0x5b   :  { %425 = vset.pattern.permute.xlu1 %v484_v31 }
  0x5c   :  { %309 = vperm.xlu1 %425, %v510_v0  }
  0x60   :  { %427 = vset.pattern.permute.xlu1 %v485_v32 }
  0x61   :  { %329 = vperm.xlu1 %427, %v510_v0  }
  0x65   :  { %428 = vset.pattern.permute.xlu1 %v477_v24 }
  0x66   :  { %339 = vperm.xlu1 %428, %v510_v0  }
  0x81   :  { %v47_v40 = vpop.permute.xlu1 %46  ;;  %v27_v41 = vpop.permute.xlu0 %26 }
  0x82   :  { %v33_v43 = vadd.f32 %v32_v37, %v27_v41  ;;  %v53_v55 = vadd.f32 %v52_v47, %v47_v40  ;;  %v186_v47 = vld [vmem:[%s620_s1 + $0x10] sm:$0xff] }
  0x84   :  { %v34_v48 = vmax.f32 %v363_v42, %v33_v43 }
  0x86   :  { %v57_v49 = vpop.permute.xlu1 %56  ;;  %v37_v50 = vpop.permute.xlu0 %36 }
  0x87   :  { %v43_v53 = vadd.f32 %v42_v45, %v37_v50  ;;  %v63_v59 = vadd.f32 %v62_v52, %v57_v49  ;;  %v183_v45 = vrot.slane %v105_v6, %v571_v3  ;;  %v194_v52 = vrot.slane %v186_v47, %v544_v35 }
  0x89   :  { %v44_v56 = vmax.f32 %v34_v48, %v43_v53  ;;  %v204_v53 = vrot.slane %v186_v47, %v550_v38 }
  0x8b   :  { %v54_v60 = vmax.f32 %v44_v56, %v53_v55  ;;  %v67_v61 = vpop.permute.xlu1 %66  ;;  %v77_v62 = vpop.permute.xlu0 %76 }
  0x8c   :  { %v73_v63 = vadd.f32 %v72_v54, %v67_v61  ;;  %v83_v1 = vadd.f32 %v82_v57, %v77_v62  ;;  %v214_v61 = vrot.slane %v186_v47, %v552_v39 }
  0x8d   :  { %v64_v0 = vmax.f32 %v54_v60, %v63_v59 }
  0x8f   :  { %v74_v4 = vmax.f32 %v64_v0, %v73_v63 }
  0x90   :  { %v87_v5 = vpop.permute.xlu1 %86  ;;  %v108_v12 = vpop.permute.xlu0 %107 }
  0x91   :  { %v84_v7 = vmax.f32 %v74_v4, %v83_v1  ;;  %v93_v8 = vadd.f32 %v92_v2, %v87_v5  ;;  %v114_v16 = vadd.f32 %v113_v10, %v108_v12  ;;  %v224_v1 = vrot.slane %v186_v47, %v557_v44 }
  0x92   :  { %v234_v2 = vrot.slane %v186_v47, %v560_v46  ;;  %v244_v10 = vrot.slane %v186_v47, %v563_v51 }
  0x93   :  { %v94_v13 = vmax.f32 %v84_v7, %v93_v8 }
  0x95   :  { %v97_v11 = vpop.permute.xlu1 %96  ;;  %v138_v24 = vpop.permute.xlu0 %137 }
  0x96   :  { %v103_v14 = vadd.f32 %v102_v9, %v97_v11  ;;  %v144_v28 = vadd.f32 %v143_v22, %v138_v24 }
  0x98   :  { %v104_v15 = vmax.f32 %v94_v13, %v103_v14  ;;  %v254_v14 = vrot.slane %v186_v47, %v568_v58 }
  0x9a   :  { %v118_v18 = vpop.permute.xlu1 %117  ;;  %v115_v19 = vmax.f32 %v104_v15, %v114_v16  ;;  %v168_v37 = vpop.permute.xlu0 %167  ;;  %v264_v15 = vrot.slane %v186_v47, %v571_v3 }
  0x9b   :  { %v124_v20 = vadd.f32 %v123_v17, %v118_v18  ;;  %v174_v43 = vadd.f32 %v173_v34, %v168_v37  ;;  %v267_v18 = vld [vmem:[%s620_s1 + $0x18] sm:$0xff]  ;;  %s486_s1 = smov [#allocation2]  }
  0x9c   :  { %s355_s22 = sshll.u32 %s486_s1, 4  ;;  %s356_s22 = int_to_ptr.vmem [resolvable:$true] %s355_s22 }
  0x9d   :  { %v125_v25 = vmax.f32 %v115_v19, %v124_v20  ;;  %s430_s23 = scalar_lea.vmem %s356_s22, 128  ;;  %p435_p1 = scmp.lt.s32.totalorder %s356_s22, %s356_s22 }
  0x9e   :  { %p431_p0 = scmp.ne.s32.totalorder %s356_s22, %s430_s23  ;;  %p436_p2 = scmp.lt.s32.totalorder %s430_s23, %s430_s23 }
  0x9f   :  { %v128_v23 = vpop.permute.xlu1 %127  ;;  %v199_v55 = vpop.permute.xlu0 %198 }
  0xa0   :  { %v134_v26 = vadd.f32 %v133_v21, %v128_v23  ;;  %v205_v60 = vadd.f32 %v204_v53, %v199_v55  ;;  %v275_v23 = vrot.slane %v267_v18, %v544_v35  ;;  %v315_v35 = vrot.slane %v267_v18, %v560_v46  ;;  %p437_p3 = por %p436_p2, %p435_p1 }
  0xa2   :  { %v135_v27 = vmax.f32 %v125_v25, %v134_v26  ;;  %p438_p4 = pnand %p437_p3, %p431_p0 }
  0xa4   :  { %v148_v30 = vpop.permute.xlu1 %147  ;;  %v145_v31 = vmax.f32 %v135_v27, %v144_v28  ;;  %v229_v5 = vpop.permute.xlu0 %228  ;;  %v285_v27 = vrot.slane %v267_v18, %v550_v38  ;;  %v295_v28 = vrot.slane %v267_v18, %v552_v39 }
  0xa5   :  { %v154_v32 = vadd.f32 %v153_v29, %v148_v30  ;;  %v235_v9 = vadd.f32 %v234_v2, %v229_v5 }
  0xa7   :  { %v155_v40 = vmax.f32 %v145_v31, %v154_v32 }
  0xa9   :  { %v158_v36 = vpop.permute.xlu1 %157  ;;  %v259_v17 = vpop.permute.xlu0 %258 }
  0xaa   :  { %v164_v41 = vadd.f32 %v163_v33, %v158_v36  ;;  %v265_v22 = vadd.f32 %v264_v15, %v259_v17  ;;  %v305_v36 = vrot.slane %v267_v18, %v557_v44  ;;  %v345_v44 = vrot.slane %v267_v18, %v571_v3 }
  0xac   :  { %v165_v42 = vmax.f32 %v155_v40, %v164_v41 }
  0xae   :  { %v178_v48 = vpop.permute.xlu1 %177  ;;  %v175_v49 = vmax.f32 %v165_v42, %v174_v43  ;;  %v290_v30 = vpop.permute.xlu0 %289  ;;  %v325_v42 = vrot.slane %v267_v18, %v563_v51 }
  0xaf   :  { %v184_v50 = vadd.f32 %v183_v45, %v178_v48  ;;  %v296_v34 = vadd.f32 %v295_v28, %v290_v30 }
  0xb1   :  { %v185_v56 = vmax.f32 %v175_v49, %v184_v50  ;;  %v335_v49 = vrot.slane %v267_v18, %v568_v58 }
  0xb3   :  { %v189_v54 = vpop.permute.xlu1 %188  ;;  %v320_v45 = vpop.permute.xlu0 %319 }
  0xb4   :  { %v195_v57 = vadd.f32 %v194_v52, %v189_v54  ;;  %v326_v48 = vadd.f32 %v325_v42, %v320_v45 }
  0xb6   :  { %v196_v59 = vmax.f32 %v185_v56, %v195_v57 }
  0xb8   :  { %v209_v62 = vpop.permute.xlu1 %208  ;;  %v206_v63 = vmax.f32 %v196_v59, %v205_v60 }
  0xb9   :  { %v215_v0 = vadd.f32 %v214_v61, %v209_v62 }
  0xbb   :  { %v216_v6 = vmax.f32 %v206_v63, %v215_v0 }
  0xbd   :  { %v219_v4 = vpop.permute.xlu1 %218 }
  0xbe   :  { %v225_v7 = vadd.f32 %v224_v1, %v219_v4 }
  0xc0   :  { %v226_v8 = vmax.f32 %v216_v6, %v225_v7 }
  0xc2   :  { %v239_v11 = vpop.permute.xlu1 %238  ;;  %v236_v12 = vmax.f32 %v226_v8, %v235_v9 }
  0xc3   :  { %v245_v13 = vadd.f32 %v244_v10, %v239_v11 }
  0xc5   :  { %v246_v19 = vmax.f32 %v236_v12, %v245_v13 }
  0xc7   :  { %v249_v16 = vpop.permute.xlu1 %248 }
  0xc8   :  { %v255_v20 = vadd.f32 %v254_v14, %v249_v16 }
  0xca   :  { %v256_v21 = vmax.f32 %v246_v19, %v255_v20 }
  0xcc   :  { %v270_v24 = vpop.permute.xlu1 %269  ;;  %v266_v25 = vmax.f32 %v256_v21, %v265_v22 }
  0xcd   :  { %v276_v26 = vadd.f32 %v275_v23, %v270_v24 }
  0xcf   :  { %v277_v31 = vmax.f32 %v266_v25, %v276_v26 }
  0xd1   :  { %v280_v29 = vpop.permute.xlu1 %279 }
  0xd2   :  { %v286_v32 = vadd.f32 %v285_v27, %v280_v29 }
  0xd4   :  { %v287_v33 = vmax.f32 %v277_v31, %v286_v32 }
  0xd6   :  { %v300_v37 = vpop.permute.xlu1 %299  ;;  %v297_v40 = vmax.f32 %v287_v33, %v296_v34 }
  0xd7   :  { %v306_v41 = vadd.f32 %v305_v36, %v300_v37 }
  0xd9   :  { %v307_v38 = vmax.f32 %v297_v40, %v306_v41 }
  0xdb   :  { %v310_v43 = vpop.permute.xlu1 %309 }
  0xdc   :  { %v316_v47 = vadd.f32 %v315_v35, %v310_v43 }
  0xde   :  { %v317_v39 = vmax.f32 %v307_v38, %v316_v47 }
  0xe0   :  { %v330_v50 = vpop.permute.xlu1 %329  ;;  %v327_v52 = vmax.f32 %v317_v39, %v326_v48 }
  0xe1   :  { %v336_v53 = vadd.f32 %v335_v49, %v330_v50 }
  0xe3   :  { %v337_v55 = vmax.f32 %v327_v52, %v336_v53 }
  0xe5   :  { %v340_v54 = vpop.permute.xlu1 %339 }
  0xe6   :  { %v346_v46 = vadd.f32 %v345_v44, %v340_v54 }
  0xe8   :  { %v347_v56 = vmax.f32 %v337_v55, %v346_v46 }
  0xea   :  { %348 = vst [vmem:[#allocation2] sm:$0xff] %v347_v56 }
  0xeb   :  { %441 = shalt.err (!%p438_p4)
}
  0xec   :  { %s442_s26 = scalar_lea.hbm %s622_s3, 128 }
  0xed   :  { %p443_p5 = scmp.ne.s32.totalorder %s622_s3, %s442_s26  ;;  %p446_p6 = scmp.lt.u32.totalorder %s442_s26, %s622_s3 }
  0xef   :  { %p448_p7 = pnand %p446_p6, %p443_p5 }
  0xf1   :  { %451 = shalt.err (!%p448_p7)
}
  0xf2   :  { %358 = dma.vmem_to_hbm [thread:$0]  %s356_s22, 128, %s622_s3, [#allocation3]  }
  0xf3   :  { %452 = dma.done.wait [#allocation3], 128  }
  0xf4   :  { %453 = vsyncadd [#allocation3], 4294967168 }
  0xf5   :  { %362 = vsyncpa [#allocation3], 1 }

</bundles_post_ra>
